<compile_context>
chip_gen: v7x
topology: tpu7x:2x2x1
jax: 0.10.0
libtpu: 0.0.40
codegen_flags: <defaults>
</compile_context>

<pallas_src>
import functools

import jax
import jax.numpy as jnp
from jax.experimental import pallas as pl
from jax.experimental.pallas import tpu as pltpu

BN_EPS = 1e-5


# --------------------------------------------------------------------------
# Conv3x3 (+ folded BN) (+ ReLU) kernel.
# Grid = (batch, Cout blocks); per-step the kernel pads one image into a VMEM
# scratch tile and runs nine shifted MXU matmuls per row-chunk, accumulating
# in a small f32 tile, then applies scale/bias/ReLU and stores bf16.
# --------------------------------------------------------------------------
def _conv3x3_kernel(x_ref, w_ref, s_ref, b_ref, o_ref, xp_ref, *,
                    H, W, relu, row_chunk):
    # x_ref : (1, H, W, Cin)    bf16 one image of the batch
    # w_ref : (9, Cin, Ct)      bf16 3x3 taps (ky*3+kx major)
    # s_ref : (1, Ct) f32 folded-BN scale;  b_ref: (1, Ct) f32 folded-BN bias
    # o_ref : (1, H, W, Ct)     bf16 output tile
    # xp_ref: (H+2, W+2, Cin)   bf16 zero-padded scratch (padding stays in VMEM)
    Cin = x_ref.shape[3]
    Ct = o_ref.shape[3]

    xp_ref[...] = jnp.zeros_like(xp_ref)
    xp_ref[1:H + 1, 1:W + 1, :] = x_ref[0]

    scale = s_ref[...]          # (1, Ct) f32
    bias = b_ref[...]           # (1, Ct) f32

    for r0 in range(0, H, row_chunk):
        xs = xp_ref[r0:r0 + row_chunk + 2, :, :]          # (rc+2, W+2, Cin)
        acc = jnp.zeros((row_chunk * W, Ct), jnp.float32)
        for dy in range(3):
            for dx in range(3):
                patch = xs[dy:dy + row_chunk, dx:dx + W, :].reshape(
                    row_chunk * W, Cin)
                acc = acc + jnp.dot(patch, w_ref[dy * 3 + dx],
                                    preferred_element_type=jnp.float32)
        y = acc * scale + bias
        if relu:
            y = jnp.maximum(y, 0.0)
        o_ref[0, r0:r0 + row_chunk, :, :] = y.reshape(
            row_chunk, W, Ct).astype(o_ref.dtype)


def _pick_row_chunk(H, W):
    # Largest chunk that divides H while keeping the f32 accumulator modest.
    for rc in (32, 16, 8, 4, 2, 1):
        if H % rc == 0 and rc * W <= 8192:
            return rc
    return 1


def conv3x3_bn_relu(x, w9, scale, bias, relu):
    # x: (N, H, W, Cin); w9: (9, Cin, Cout) bf16; scale/bias: (1, Cout) f32
    x = x.astype(jnp.bfloat16)
    N, H, W, Cin = x.shape
    Cout = w9.shape[2]
    tc = Cout if Cout <= 256 else 256            # lane-dense Cout tile
    row_chunk = _pick_row_chunk(H, W)
    kernel = functools.partial(_conv3x3_kernel, H=H, W=W, relu=relu,
                               row_chunk=row_chunk)
    return pl.pallas_call(
        kernel,
        out_shape=jax.ShapeDtypeStruct((N, H, W, Cout), jnp.bfloat16),
        grid=(N, Cout // tc),
        in_specs=[
            pl.BlockSpec((1, H, W, Cin), lambda n, c: (n, 0, 0, 0)),
            pl.BlockSpec((9, Cin, tc), lambda n, c: (0, 0, c)),
            pl.BlockSpec((1, tc), lambda n, c: (0, c)),
            pl.BlockSpec((1, tc), lambda n, c: (0, c)),
        ],
        out_specs=pl.BlockSpec((1, H, W, tc), lambda n, c: (n, 0, 0, c)),
        scratch_shapes=[pltpu.VMEM((H + 2, W + 2, Cin), jnp.bfloat16)],
        compiler_params=pltpu.CompilerParams(
            dimension_semantics=("parallel", "parallel"),
            vmem_limit_bytes=48 * 1024 * 1024,
        ),
    )(x, w9, scale, bias)


# --------------------------------------------------------------------------
# 2x2 max-pool kernel, tiled per image (the wrapper 6-D reshape is a free
# row-major view; the reduction itself runs in Pallas).
# --------------------------------------------------------------------------
def _maxpool2x2_kernel(x_ref, o_ref):
    # x_ref: (1, H/2, 2, W/2, 2, C)  ->  o_ref: (1, H/2, W/2, C)
    x = x_ref[...]
    y = jnp.max(x, axis=4)
    o_ref[...] = jnp.max(y, axis=2)


def maxpool2x2(x):
    N, H, W, C = x.shape
    H2, W2 = H // 2, W // 2
    xr = x.reshape(N, H2, 2, W2, 2, C)   # free view, no HBM copy
    return pl.pallas_call(
        _maxpool2x2_kernel,
        out_shape=jax.ShapeDtypeStruct((N, H2, W2, C), x.dtype),
        grid=(N,),
        in_specs=[pl.BlockSpec((1, H2, 2, W2, 2, C),
                               lambda n: (n, 0, 0, 0, 0, 0))],
        out_specs=pl.BlockSpec((1, H2, W2, C), lambda n: (n, 0, 0, 0)),
        compiler_params=pltpu.CompilerParams(
            dimension_semantics=("parallel",),
            vmem_limit_bytes=32 * 1024 * 1024,
        ),
    )(xr)


# --------------------------------------------------------------------------
# Fused image-MSE + TV-loss + adversarial kernel: single pass over the image
# pair, grid over batch, accumulators in VMEM scratch, finalize on last step.
# --------------------------------------------------------------------------
def _image_loss_kernel(xo_ref, xt_ref, lab_ref, mse_ref, tv_ref, adv_ref,
                       ssd_ref, htv_ref, wtv_ref, *, n_batch, tv_weight):
    b = pl.program_id(0)

    @pl.when(b == 0)
    def _init():
        ssd_ref[...] = jnp.zeros_like(ssd_ref)
        htv_ref[...] = jnp.zeros_like(htv_ref)
        wtv_ref[...] = jnp.zeros_like(wtv_ref)

    H, W, C = xo_ref.shape[1], xo_ref.shape[2], xo_ref.shape[3]
    xo = xo_ref[0].astype(jnp.float32)        # (H, W, C)
    xt = xt_ref[0].astype(jnp.float32)

    d = xo - xt
    ssd_ref[...] = ssd_ref[...] + jnp.sum(d * d)

    dh = xo[1:H, :, :] - xo[0:H - 1, :, :]
    dw = xo[:, 1:W, :] - xo[:, 0:W - 1, :]
    htv_ref[...] = htv_ref[...] + jnp.sum(dh * dh)
    wtv_ref[...] = wtv_ref[...] + jnp.sum(dw * dw)

    @pl.when(b == n_batch - 1)
    def _finalize():
        count_h = float(C * (H - 1) * W)
        count_w = float(C * H * (W - 1))
        mse_ref[...] = ssd_ref[...] * (1.0 / float(n_batch * H * W * C))
        tv_ref[...] = (tv_weight * 2.0 / float(n_batch)) * (
            htv_ref[...] * (1.0 / count_h) + wtv_ref[...] * (1.0 / count_w))
        adv_ref[...] = jnp.zeros_like(adv_ref) + jnp.mean(
            1.0 - lab_ref[...].astype(jnp.float32))


def fused_image_losses(x_out, x_tgt, labels, tv_weight=1.0):
    N, H, W, C = x_out.shape
    lab2d = labels.reshape(1, N).astype(jnp.float32)
    kernel = functools.partial(_image_loss_kernel, n_batch=N,
                               tv_weight=tv_weight)
    mse, tv, adv = pl.pallas_call(
        kernel,
        out_shape=(jax.ShapeDtypeStruct((1, 1), jnp.float32),
                   jax.ShapeDtypeStruct((1, 1), jnp.float32),
                   jax.ShapeDtypeStruct((1, 1), jnp.float32)),
        grid=(N,),
        in_specs=[
            pl.BlockSpec((1, H, W, C), lambda b: (b, 0, 0, 0)),
            pl.BlockSpec((1, H, W, C), lambda b: (b, 0, 0, 0)),
            pl.BlockSpec((1, N), lambda b: (0, 0)),
        ],
        out_specs=(
            pl.BlockSpec((1, 1), lambda b: (0, 0)),
            pl.BlockSpec((1, 1), lambda b: (0, 0)),
            pl.BlockSpec((1, 1), lambda b: (0, 0)),
        ),
        scratch_shapes=[pltpu.VMEM((1, 1), jnp.float32) for _ in range(3)],
        compiler_params=pltpu.CompilerParams(
            dimension_semantics=("arbitrary",),
            vmem_limit_bytes=32 * 1024 * 1024,
        ),
    )(x_out, x_tgt, lab2d)
    return mse[0, 0], tv[0, 0], adv[0, 0]


# --------------------------------------------------------------------------
# Perception MSE between the two halves of the single fused VGG pass.
# --------------------------------------------------------------------------
def _feature_mse_kernel(fa_ref, fb_ref, o_ref, acc_ref, *, n_pair):
    b = pl.program_id(0)

    @pl.when(b == 0)
    def _init():
        acc_ref[...] = jnp.zeros_like(acc_ref)

    d = fa_ref[...].astype(jnp.float32) - fb_ref[...].astype(jnp.float32)
    acc_ref[...] = acc_ref[...] + jnp.sum(d * d)

    @pl.when(b == n_pair - 1)
    def _finalize():
        _, h, w, c = fa_ref.shape
        o_ref[...] = acc_ref[...] * (1.0 / float(n_pair * h * w * c))


def feature_mse(feats, n_pair):
    # feats: (2*n_pair, h, w, C); MSE(feats[:n_pair], feats[n_pair:])
    _, h, w, C = feats.shape
    out = pl.pallas_call(
        functools.partial(_feature_mse_kernel, n_pair=n_pair),
        out_shape=jax.ShapeDtypeStruct((1, 1), jnp.float32),
        grid=(n_pair,),
        in_specs=[
            pl.BlockSpec((1, h, w, C), lambda b: (b, 0, 0, 0)),
            pl.BlockSpec((1, h, w, C), lambda b: (b + n_pair, 0, 0, 0)),
        ],
        out_specs=pl.BlockSpec((1, 1), lambda b: (0, 0)),
        scratch_shapes=[pltpu.VMEM((1, 1), jnp.float32)],
        compiler_params=pltpu.CompilerParams(
            dimension_semantics=("arbitrary",),
            vmem_limit_bytes=32 * 1024 * 1024,
        ),
    )(feats, feats)
    return out[0, 0]


# --------------------------------------------------------------------------
# VGG16-bn features[:31] parameter init (deterministic, synthetic) & forward.
# --------------------------------------------------------------------------
# (Cin, Cout, has_bn_and_relu) or 'M' for maxpool
_VGG_CFG = [
    (3, 64, True), (64, 64, True), 'M',
    (64, 128, True), (128, 128, True), 'M',
    (128, 256, True), (256, 256, True), (256, 256, True), 'M',
    (256, 512, True), (512, 512, True), (512, 512, False),
]


def init_vgg_params(key):
    params = []
    for item in _VGG_CFG:
        if item == 'M':
            params.append('M')
            continue
        cin, cout, has_bn = item
        key, k1, k2, k3, k4, k5, k6 = jax.random.split(key, 7)
        w = jax.random.normal(k1, (3, 3, cin, cout), jnp.float32) / jnp.sqrt(9.0 * cin)
        b = 0.01 * jax.random.normal(k2, (cout,), jnp.float32)
        if has_bn:
            gamma = 1.0 + 0.1 * jax.random.normal(k3, (cout,), jnp.float32)
            beta = 0.1 * jax.random.normal(k4, (cout,), jnp.float32)
            r_mean = 0.1 * jax.random.normal(k5, (cout,), jnp.float32)
            r_var = 0.5 + jax.random.uniform(k6, (cout,), jnp.float32)
            s = gamma / jnp.sqrt(r_var + BN_EPS)
            scale = s
            bias = (b - r_mean) * s + beta
        else:
            scale = jnp.ones((cout,), jnp.float32)
            bias = b
        params.append((w.reshape(9, cin, cout).astype(jnp.bfloat16),
                       scale.reshape(1, cout).astype(jnp.float32),
                       bias.reshape(1, cout).astype(jnp.float32),
                       has_bn))  # has_bn implies relu in this prefix
    return params


def vgg_features(x_nhwc_bf16, params):
    x = x_nhwc_bf16
    for p in params:
        if p == 'M':
            x = maxpool2x2(x)
        else:
            w9, scale, bias, relu = p
            x = conv3x3_bn_relu(x, w9, scale, bias, relu)
    return x


# --------------------------------------------------------------------------
# GeneratorLoss forward
# --------------------------------------------------------------------------
def generator_loss(out_labels, out_images_nchw, target_images_nchw, params):
    # transpose NCHW -> NHWC once at the boundary (glue)
    x_out = jnp.transpose(out_images_nchw, (0, 2, 3, 1)).astype(jnp.float32)
    x_tgt = jnp.transpose(target_images_nchw, (0, 2, 3, 1)).astype(jnp.float32)
    n = x_out.shape[0]

    # fused image MSE + TV + adversarial (single pass over the images)
    image, tv, adv = fused_image_losses(x_out, x_tgt, out_labels, tv_weight=1.0)

    # single VGG pass on the concatenated batch (bf16 activations/weights)
    vgg_in = jnp.concatenate([x_out, x_tgt], axis=0).astype(jnp.bfloat16)
    feats = vgg_features(vgg_in, params)
    perception = feature_mse(feats, n)

    return image + 0.001 * adv + 0.006 * perception + 2e-8 * tv


if __name__ == "__main__":
    key = jax.random.PRNGKey(0)
    k_lab, k_out, k_tgt, k_par = jax.random.split(key, 4)

    N, C, H, W = 2, 3, 16, 16
    out_labels = jax.random.uniform(k_lab, (N,), jnp.float32)
    out_images = jax.random.uniform(k_out, (N, C, H, W), jnp.float32)
    target_images = jax.random.uniform(k_tgt, (N, C, H, W), jnp.float32)

    params = init_vgg_params(k_par)

    loss = generator_loss(out_labels, out_images, target_images, params)
    jax.block_until_ready(loss)
    print("KERNEL_OK")
</pallas_src>

<mosaic_0001>
module attributes {stable_mosaic.version = 11 : i64} {
  func.func @_image_loss_kernel(%arg0: i32, %arg1: memref<1x16x16x3xf32, #tpu.memory_space<vmem>>, %arg2: memref<1x16x16x3xf32, #tpu.memory_space<vmem>>, %arg3: memref<1x2xf32, #tpu.memory_space<vmem>>, %arg4: memref<1x1xf32, #tpu.memory_space<vmem>>, %arg5: memref<1x1xf32, #tpu.memory_space<vmem>>, %arg6: memref<1x1xf32, #tpu.memory_space<vmem>>, %arg7: memref<1x1xf32, #tpu.memory_space<vmem>>, %arg8: memref<1x1xf32, #tpu.memory_space<vmem>>, %arg9: memref<1x1xf32, #tpu.memory_space<vmem>>) attributes {dimension_semantics = [#tpu.dimension_semantics<arbitrary>], iteration_bounds = array<i64: 2>, scalar_prefetch = 0 : i64, scratch_operands = 3 : i64, tpu.core_type = #tpu.core_type<tc>, window_params = [{transform_indices = @transform_0, window_bounds = array<i64: 1, 16, 16, 3>}, {transform_indices = @transform_1, window_bounds = array<i64: 1, 16, 16, 3>}, {pipeline_mode = #tpu.pipeline_mode<synchronous>, transform_indices = @transform_2, window_bounds = array<i64: 1, 2>}, {pipeline_mode = #tpu.pipeline_mode<synchronous>, transform_indices = @transform_3, window_bounds = array<i64: 1, 1>}, {pipeline_mode = #tpu.pipeline_mode<synchronous>, transform_indices = @transform_4, window_bounds = array<i64: 1, 1>}, {pipeline_mode = #tpu.pipeline_mode<synchronous>, transform_indices = @transform_5, window_bounds = array<i64: 1, 1>}]} {
    %c0_i32 = arith.constant 0 : i32
    %0 = arith.cmpi eq, %arg0, %c0_i32 : i32
    %1 = arith.extui %0 : i1 to i32
    %c0_i32_0 = arith.constant 0 : i32
    %2 = arith.cmpi ne, %1, %c0_i32_0 : i32
    scf.if %2 {
      %cst_23 = arith.constant 0.000000e+00 : f32
      %44 = vector.broadcast %cst_23 : f32 to vector<1x1xf32>
      %c0_24 = arith.constant 0 : index
      %c0_25 = arith.constant 0 : index
      %45 = vector.load %arg7[%c0_24, %c0_25] : memref<1x1xf32, #tpu.memory_space<vmem>>, vector<1x1xf32>
      tpu.vector_store %arg7[%c0_24, %c0_25], %44 {strides = array<i32>} : memref<1x1xf32, #tpu.memory_space<vmem>>, vector<1x1xf32>,
      %cst_26 = arith.constant 0.000000e+00 : f32
      %46 = vector.broadcast %cst_26 : f32 to vector<1x1xf32>
      %c0_27 = arith.constant 0 : index
      %c0_28 = arith.constant 0 : index
      %47 = vector.load %arg8[%c0_27, %c0_28] : memref<1x1xf32, #tpu.memory_space<vmem>>, vector<1x1xf32>
      tpu.vector_store %arg8[%c0_27, %c0_28], %46 {strides = array<i32>} : memref<1x1xf32, #tpu.memory_space<vmem>>, vector<1x1xf32>,
      %cst_29 = arith.constant 0.000000e+00 : f32
      %48 = vector.broadcast %cst_29 : f32 to vector<1x1xf32>
      %c0_30 = arith.constant 0 : index
      %c0_31 = arith.constant 0 : index
      %49 = vector.load %arg9[%c0_30, %c0_31] : memref<1x1xf32, #tpu.memory_space<vmem>>, vector<1x1xf32>
      tpu.vector_store %arg9[%c0_30, %c0_31], %48 {strides = array<i32>} : memref<1x1xf32, #tpu.memory_space<vmem>>, vector<1x1xf32>,
    } else {
    }
    %c0 = arith.constant 0 : index
    %c0_1 = arith.constant 0 : index
    %c0_2 = arith.constant 0 : index
    %c0_3 = arith.constant 0 : index
    %3 = vector.load %arg1[%c0, %c0_1, %c0_2, %c0_3] : memref<1x16x16x3xf32, #tpu.memory_space<vmem>>, vector<1x16x16x3xf32>
    %4 = vector.shape_cast %3 : vector<1x16x16x3xf32> to vector<16x16x3xf32>
    %c0_4 = arith.constant 0 : index
    %c0_5 = arith.constant 0 : index
    %c0_6 = arith.constant 0 : index
    %c0_7 = arith.constant 0 : index
    %5 = vector.load %arg2[%c0_4, %c0_5, %c0_6, %c0_7] : memref<1x16x16x3xf32, #tpu.memory_space<vmem>>, vector<1x16x16x3xf32>
    %6 = vector.shape_cast %5 : vector<1x16x16x3xf32> to vector<16x16x3xf32>
    %7 = arith.subf %4, %6 : vector<16x16x3xf32>
    %c0_8 = arith.constant 0 : index
    %c0_9 = arith.constant 0 : index
    %8 = vector.load %arg7[%c0_8, %c0_9] : memref<1x1xf32, #tpu.memory_space<vmem>>, vector<1x1xf32>
    %9 = arith.mulf %7, %7 : vector<16x16x3xf32>
    %10 = vector.shape_cast %9 : vector<16x16x3xf32> to vector<1x16x16x3xf32>
    %cst = arith.constant dense<0.000000e+00> : vector<1xf32>
    %11 = vector.multi_reduction <add>, %10, %cst [1, 2, 3] : vector<1x16x16x3xf32> to vector<1xf32>
    %12 = vector.shape_cast %11 : vector<1xf32> to vector<1x1x1x1xf32>
    %13 = vector.extract %12[0, 0, 0, 0] : f32 from vector<1x1x1x1xf32>
    %14 = vector.broadcast %13 : f32 to vector<1x1xf32>
    %15 = arith.addf %8, %14 : vector<1x1xf32>
    %c0_10 = arith.constant 0 : index
    %c0_11 = arith.constant 0 : index
    %16 = vector.load %arg7[%c0_10, %c0_11] : memref<1x1xf32, #tpu.memory_space<vmem>>, vector<1x1xf32>
    tpu.vector_store %arg7[%c0_10, %c0_11], %15 {strides = array<i32>} : memref<1x1xf32, #tpu.memory_space<vmem>>, vector<1x1xf32>,
    %17 = vector.extract_strided_slice %4 {offsets = [1, 0, 0], sizes = [15, 16, 3], strides = [1, 1, 1]} : vector<16x16x3xf32> to vector<15x16x3xf32>
    %18 = vector.extract_strided_slice %4 {offsets = [0, 0, 0], sizes = [15, 16, 3], strides = [1, 1, 1]} : vector<16x16x3xf32> to vector<15x16x3xf32>
    %19 = arith.subf %17, %18 : vector<15x16x3xf32>
    %20 = vector.extract_strided_slice %4 {offsets = [0, 1, 0], sizes = [16, 15, 3], strides = [1, 1, 1]} : vector<16x16x3xf32> to vector<16x15x3xf32>
    %21 = vector.extract_strided_slice %4 {offsets = [0, 0, 0], sizes = [16, 15, 3], strides = [1, 1, 1]} : vector<16x16x3xf32> to vector<16x15x3xf32>
    %22 = arith.subf %20, %21 : vector<16x15x3xf32>
    %c0_12 = arith.constant 0 : index
    %c0_13 = arith.constant 0 : index
    %23 = vector.load %arg8[%c0_12, %c0_13] : memref<1x1xf32, #tpu.memory_space<vmem>>, vector<1x1xf32>
    %24 = arith.mulf %19, %19 : vector<15x16x3xf32>
    %25 = vector.shape_cast %24 : vector<15x16x3xf32> to vector<1x15x16x3xf32>
    %cst_14 = arith.constant dense<0.000000e+00> : vector<1xf32>
    %26 = vector.multi_reduction <add>, %25, %cst_14 [1, 2, 3] : vector<1x15x16x3xf32> to vector<1xf32>
    %27 = vector.shape_cast %26 : vector<1xf32> to vector<1x1x1x1xf32>
    %28 = vector.extract %27[0, 0, 0, 0] : f32 from vector<1x1x1x1xf32>
    %29 = vector.broadcast %28 : f32 to vector<1x1xf32>
    %30 = arith.addf %23, %29 : vector<1x1xf32>
    %c0_15 = arith.constant 0 : index
    %c0_16 = arith.constant 0 : index
    %31 = vector.load %arg8[%c0_15, %c0_16] : memref<1x1xf32, #tpu.memory_space<vmem>>, vector<1x1xf32>
    tpu.vector_store %arg8[%c0_15, %c0_16], %30 {strides = array<i32>} : memref<1x1xf32, #tpu.memory_space<vmem>>, vector<1x1xf32>,
    %c0_17 = arith.constant 0 : index
    %c0_18 = arith.constant 0 : index
    %32 = vector.load %arg9[%c0_17, %c0_18] : memref<1x1xf32, #tpu.memory_space<vmem>>, vector<1x1xf32>
    %33 = arith.mulf %22, %22 : vector<16x15x3xf32>
    %34 = vector.shape_cast %33 : vector<16x15x3xf32> to vector<1x16x15x3xf32>
    %cst_19 = arith.constant dense<0.000000e+00> : vector<1xf32>
    %35 = vector.multi_reduction <add>, %34, %cst_19 [1, 2, 3] : vector<1x16x15x3xf32> to vector<1xf32>
    %36 = vector.shape_cast %35 : vector<1xf32> to vector<1x1x1x1xf32>
    %37 = vector.extract %36[0, 0, 0, 0] : f32 from vector<1x1x1x1xf32>
    %38 = vector.broadcast %37 : f32 to vector<1x1xf32>
    %39 = arith.addf %32, %38 : vector<1x1xf32>
    %c0_20 = arith.constant 0 : index
    %c0_21 = arith.constant 0 : index
    %40 = vector.load %arg9[%c0_20, %c0_21] : memref<1x1xf32, #tpu.memory_space<vmem>>, vector<1x1xf32>
    tpu.vector_store %arg9[%c0_20, %c0_21], %39 {strides = array<i32>} : memref<1x1xf32, #tpu.memory_space<vmem>>, vector<1x1xf32>,
    %c1_i32 = arith.constant 1 : i32
    %41 = arith.cmpi eq, %arg0, %c1_i32 : i32
    %42 = arith.extui %41 : i1 to i32
    %c0_i32_22 = arith.constant 0 : i32
    %43 = arith.cmpi ne, %42, %c0_i32_22 : i32
    scf.if %43 {
      %c0_23 = arith.constant 0 : index
      %c0_24 = arith.constant 0 : index
      %44 = vector.load %arg7[%c0_23, %c0_24] : memref<1x1xf32, #tpu.memory_space<vmem>>, vector<1x1xf32>
      %cst_25 = arith.constant 6.51041686E-4 : f32
      %45 = vector.broadcast %cst_25 : f32 to vector<1x1xf32>
      %46 = arith.mulf %44, %45 : vector<1x1xf32>
      %c0_26 = arith.constant 0 : index
      %c0_27 = arith.constant 0 : index
      %47 = vector.load %arg4[%c0_26, %c0_27] : memref<1x1xf32, #tpu.memory_space<vmem>>, vector<1x1xf32>
      tpu.vector_store %arg4[%c0_26, %c0_27], %46 {strides = array<i32>} : memref<1x1xf32, #tpu.memory_space<vmem>>, vector<1x1xf32>,
      %c0_28 = arith.constant 0 : index
      %c0_29 = arith.constant 0 : index
      %48 = vector.load %arg8[%c0_28, %c0_29] : memref<1x1xf32, #tpu.memory_space<vmem>>, vector<1x1xf32>
      %cst_30 = arith.constant 0.00138888892 : f32
      %49 = vector.broadcast %cst_30 : f32 to vector<1x1xf32>
      %50 = arith.mulf %48, %49 : vector<1x1xf32>
      %c0_31 = arith.constant 0 : index
      %c0_32 = arith.constant 0 : index
      %51 = vector.load %arg9[%c0_31, %c0_32] : memref<1x1xf32, #tpu.memory_space<vmem>>, vector<1x1xf32>
      %cst_33 = arith.constant 0.00138888892 : f32
      %52 = vector.broadcast %cst_33 : f32 to vector<1x1xf32>
      %53 = arith.mulf %51, %52 : vector<1x1xf32>
      %54 = arith.addf %50, %53 : vector<1x1xf32>
      %cst_34 = arith.constant 1.000000e+00 : f32
      %55 = vector.broadcast %cst_34 : f32 to vector<1x1xf32>
      %56 = arith.mulf %55, %54 : vector<1x1xf32>
      %c0_35 = arith.constant 0 : index
      %c0_36 = arith.constant 0 : index
      %57 = vector.load %arg5[%c0_35, %c0_36] : memref<1x1xf32, #tpu.memory_space<vmem>>, vector<1x1xf32>
      tpu.vector_store %arg5[%c0_35, %c0_36], %56 {strides = array<i32>} : memref<1x1xf32, #tpu.memory_space<vmem>>, vector<1x1xf32>,
      %cst_37 = arith.constant 0.000000e+00 : f32
      %58 = vector.broadcast %cst_37 : f32 to vector<1x1xf32>
      %c0_38 = arith.constant 0 : index
      %c0_39 = arith.constant 0 : index
      %59 = vector.load %arg3[%c0_38, %c0_39] : memref<1x2xf32, #tpu.memory_space<vmem>>, vector<1x2xf32>
      %cst_40 = arith.constant 1.000000e+00 : f32
      %60 = vector.broadcast %cst_40 : f32 to vector<1x2xf32>
      %61 = arith.subf %60, %59 : vector<1x2xf32>
      %62 = vector.shape_cast %61 : vector<1x2xf32> to vector<1x1x2xf32>
      %cst_41 = arith.constant dense<0.000000e+00> : vector<1xf32>
      %63 = vector.multi_reduction <add>, %62, %cst_41 [1, 2] : vector<1x1x2xf32> to vector<1xf32>
      %64 = vector.shape_cast %63 : vector<1xf32> to vector<1x1x1xf32>
      %65 = vector.extract %64[0, 0, 0] : f32 from vector<1x1x1xf32>
      %cst_42 = arith.constant 2.000000e+00 : f32
      %66 = arith.divf %65, %cst_42 : f32
      %67 = vector.broadcast %66 : f32 to vector<1x1xf32>
      %68 = arith.addf %58, %67 : vector<1x1xf32>
      %c0_43 = arith.constant 0 : index
      %c0_44 = arith.constant 0 : index
      %69 = vector.load %arg6[%c0_43, %c0_44] : memref<1x1xf32, #tpu.memory_space<vmem>>, vector<1x1xf32>
      tpu.vector_store %arg6[%c0_43, %c0_44], %68 {strides = array<i32>} : memref<1x1xf32, #tpu.memory_space<vmem>>, vector<1x1xf32>,
    } else {
    }
    return
  }
  func.func @transform_0(%arg0: i32) -> (i32, i32, i32, i32) {
    %c0_i32 = arith.constant 0 : i32
    %c0_i32_0 = arith.constant 0 : i32
    %c0_i32_1 = arith.constant 0 : i32
    %c0_i32_2 = arith.constant 0 : i32
    return %arg0, %c0_i32, %c0_i32_0, %c0_i32_1 : i32, i32, i32, i32
  }
  func.func @transform_1(%arg0: i32) -> (i32, i32, i32, i32) {
    %c0_i32 = arith.constant 0 : i32
    %c0_i32_0 = arith.constant 0 : i32
    %c0_i32_1 = arith.constant 0 : i32
    %c0_i32_2 = arith.constant 0 : i32
    return %arg0, %c0_i32, %c0_i32_0, %c0_i32_1 : i32, i32, i32, i32
  }
  func.func @transform_2(%arg0: i32) -> (i32, i32) {
    %c0_i32 = arith.constant 0 : i32
    %c0_i32_0 = arith.constant 0 : i32
    %c0_i32_1 = arith.constant 0 : i32
    return %c0_i32, %c0_i32_0 : i32, i32
  }
  func.func @transform_3(%arg0: i32) -> (i32, i32) {
    %c0_i32 = arith.constant 0 : i32
    %c0_i32_0 = arith.constant 0 : i32
    %c0_i32_1 = arith.constant 0 : i32
    return %c0_i32, %c0_i32_0 : i32, i32
  }
  func.func @transform_4(%arg0: i32) -> (i32, i32) {
    %c0_i32 = arith.constant 0 : i32
    %c0_i32_0 = arith.constant 0 : i32
    %c0_i32_1 = arith.constant 0 : i32
    return %c0_i32, %c0_i32_0 : i32, i32
  }
  func.func @transform_5(%arg0: i32) -> (i32, i32) {
    %c0_i32 = arith.constant 0 : i32
    %c0_i32_0 = arith.constant 0 : i32
    %c0_i32_1 = arith.constant 0 : i32
    return %c0_i32, %c0_i32_0 : i32, i32
  }
}

</mosaic_0001>

<bundles_post_ra>
// kernel: tpu_custom_call.1
= control target key start
LH: loop header
LB: loop body
LE: loop exit
PB: predicated region body
PF: predicated region fallthrough
CT: control target
= control target key end

     0   :  { %11 = vsyncpa [#allocation6], 0  ;;  %s1780_s0 = inlined_call_operand.vmem [shape: f32[2,16,16,3], index: 0, kind: input, shape index: {}]   ;;  %s1781_s1 = inlined_call_operand.vmem [shape: f32[2,16,16,3], index: 1, kind: input, shape index: {}]   ;;  %s1782_s2 = inlined_call_operand.vmem [shape: f32[1,2], index: 2, kind: input, shape index: {}]   ;;  %s1783_s3 = inlined_call_operand.hbm [shape: f32[1,1], index: 3, kind: output, shape index: {0}]   ;;  %s1784_s4 = inlined_call_operand.hbm [shape: f32[1,1], index: 4, kind: output, shape index: {1}]   ;;  %s1785_s5 = inlined_call_operand.hbm [shape: f32[1,1], index: 5, kind: output, shape index: {2}]  }
   0x1   :  { %12 = vsyncpa [#allocation8], 0  ;;  %s1259_s18 = smov 0  }
   0x2 LB: > { %s1265_s19 = sadd.s32 4294967295, %s1223_s18   ;;  %p1076_p0 = scmp.ge.s32.totalorder %s1223_s18, 1  ;;  %s1223_s18 = sphi %s1259_s18, %s18_s18  }
   0x3   : > { %p189_p1 = scmp.lt.s32.totalorder %s1223_s18, 3 }
   0x5   : > { %p190_p2 = pnand %p1076_p0, %p189_p1 }
   0x6   : > { %p217_p3 = scmp.lt.s32.totalorder (!%p190_p2), %s1265_s19, 1  ;;  %p1081_p4 = scmp.ne.s32.totalorder (!%p190_p2), %s1265_s19, 0 }
   0x7   : > { %193 = sbr.rel (%p190_p2) target bundleno = 454 (0x1c6), region = 32 }
   0xe   : > { %s218_s20 = scalar_select %p217_p3, %s1265_s19, 1 }
   0xf   : > { %230 = sbr.rel (%p1081_p4) target bundleno = 22 (0x16), region = 36  ;;  %vm231_vm0 = vcmask (!%p1081_p4), 0   ;;  %v1225_v0 = vmov (!%p1081_p4), 0.0  }
  0x10   : > { %s1091_s21 = sshll.u32 %s218_s20, 8  ;;  %232 = vst.msk [vmem:[#allocation2] sm:$0x1] (!%p1081_p4), %vm231_vm0, %v1225_v0  ;;  %233 = vst.msk [vmem:[#allocation3] sm:$0x1] (!%p1081_p4), %vm231_vm0, %v1225_v0 }
  0x11   : > { %s1274_s24 = scalar_lea.vmem %s1780_s0, %s1091_s21  ;;  %s1279_s27 = scalar_lea.vmem %s1781_s1, %s1091_s21  ;;  %234 = vst.msk [vmem:[#allocation4] sm:$0x1] (!%p1081_p4), %vm231_vm0, %v1225_v0 }
  0x16 PF: > { %v1283_v1 = vld [vmem:[%s1274_s24] sm:$0xff]  ;;  %v1286_v2 = vld [vmem:[%s1274_s24 + $0x8] sm:$0xff]  ;;  %v1289_v3 = vld [vmem:[%s1274_s24 + $0x10] sm:$0xff]  ;;  %vm364_vm1 = vcmask 23552   ;;  %vm503_vm2 = vcmask 1040384   ;;  %vm783_vm3 = vcmask 1046528  }
  0x17   : > { %v267_v4 = vld [vmem:[%s1279_s27] sm:$0xff]  ;;  %v268_v5 = vld [vmem:[%s1279_s27 + $0x8] sm:$0xff]  ;;  %v269_v6 = vld [vmem:[%s1279_s27 + $0x10] sm:$0xff]  ;;  %v441_v47 = vsub.f32 %v1289_v3, %v1283_v1  ;;  %vm865_vm4 = vcmask 22528   ;;  %vm439_vm5 = vcmask 0   ;;  %p1082_p5 = scmp.ne.s32.totalorder %s1265_s19, 1 }
  0x18   : > { %v270_v7 = vld [vmem:[%s1279_s27 + $0x18] sm:$0xff]  ;;  %v299_v8 = vsub.f32 %v1283_v1, %v267_v4  ;;  %v300_v9 = vsub.f32 %v1286_v2, %v268_v5  ;;  %v301_v10 = vsub.f32 %v1289_v3, %v269_v6  ;;  %v1302_v12 = vld [vmem:[%s1274_s24 + $0x20] sm:$0xff]  ;;  %v272_v15 = vld [vmem:[%s1279_s27 + $0x28] sm:$0xff]  ;;  %vm955_vm6 = vcmask (!%p1082_p5), 8192  }
  0x19   : > { %v1299_v11 = vld [vmem:[%s1274_s24 + $0x18] sm:$0xff]  ;;  %v271_v13 = vld [vmem:[%s1279_s27 + $0x20] sm:$0xff]  ;;  %v1308_v16 = vld [vmem:[%s1274_s24 + $0x30] sm:$0xff]  ;;  %v443_v56 = vsub.f32 %v1302_v12, %v1289_v3 }
  0x1a   : > { %v302_v14 = vsub.f32 %v1299_v11, %v270_v7  ;;  %v273_v17 = vld [vmem:[%s1279_s27 + $0x30] sm:$0xff]  ;;  %v303_v18 = vsub.f32 %v1302_v12, %v271_v13  ;;  %v332_v19 = vmul.f32 %v299_v8, %v299_v8  ;;  %v333_v20 = vmul.f32 %v300_v9, %v300_v9  ;;  %v1313_v22 = vld [vmem:[%s1274_s24 + $0x28] sm:$0xff]  ;;  %v274_v25 = vld [vmem:[%s1279_s27 + $0x38] sm:$0xff] }
  0x1b   : > { %v334_v21 = vmul.f32 %v301_v10, %v301_v10  ;;  %v304_v23 = vsub.f32 %v1313_v22, %v272_v15  ;;  %v305_v26 = vsub.f32 %v1308_v16, %v273_v17  ;;  %v1322_v31 = vld [vmem:[%s1274_s24 + $0x38] sm:$0xff]  ;;  %v1325_v32 = vld [vmem:[%s1274_s24 + $0x40] sm:$0xff]  ;;  %v276_v38 = vld [vmem:[%s1279_s27 + $0x48] sm:$0xff]  ;;  %v442_v55 = vsub.f32 %v1299_v11, %v1286_v2 }
  0x1c   : > { %v335_v24 = vmul.f32 %v302_v14, %v302_v14  ;;  %v336_v27 = vmul.f32 %v303_v18, %v303_v18  ;;  %v365_v28 = vsel %vm364_vm1, %v332_v19, 0.0  ;;  %v366_v29 = vsel %vm364_vm1, %v333_v20, 0.0  ;;  %v275_v33 = vld [vmem:[%s1279_s27 + $0x40] sm:$0xff]  ;;  %v1334_v43 = vld [vmem:[%s1274_s24 + $0x48] sm:$0xff]  ;;  %v1337_v44 = vld [vmem:[%s1274_s24 + $0x50] sm:$0xff] }
  0x1d   : > { %v368_v30 = vsel %vm364_vm1, %v334_v21, 0.0  ;;  %v367_v34 = vadd.f32 %v366_v29, %v365_v28  ;;  %v306_v35 = vsub.f32 %v1322_v31, %v274_v25  ;;  %v337_v36 = vmul.f32 %v304_v23, %v304_v23  ;;  %v277_v45 = vld [vmem:[%s1279_s27 + $0x50] sm:$0xff]  ;;  %v278_v53 = vld [vmem:[%s1279_s27 + $0x58] sm:$0xff]  ;;  %v1360_v63 = vld [vmem:[%s1274_s24 + $0x60] sm:$0xff] }
  0x1e   : > { %v370_v37 = vsel %vm364_vm1, %v335_v24, 0.0  ;;  %v307_v40 = vsub.f32 %v1325_v32, %v275_v33  ;;  %v338_v41 = vmul.f32 %v305_v26, %v305_v26  ;;  %v372_v42 = vsel %vm364_vm1, %v336_v27, 0.0  ;;  %v1357_v62 = vld [vmem:[%s1274_s24 + $0x58] sm:$0xff]  ;;  %v279_v0 = vld [vmem:[%s1279_s27 + $0x60] sm:$0xff]  ;;  %v280_v14 = vld [vmem:[%s1279_s27 + $0x68] sm:$0xff] }
  0x1f   : > { %v369_v39 = vadd.f32 %v368_v30, %v367_v34  ;;  %v308_v49 = vsub.f32 %v1334_v43, %v276_v38  ;;  %v339_v50 = vmul.f32 %v306_v35, %v306_v35  ;;  %v374_v51 = vsel %vm364_vm1, %v337_v36, 0.0  ;;  %v1378_v25 = vld [vmem:[%s1274_s24 + $0x68] sm:$0xff]  ;;  %v1381_v26 = vld [vmem:[%s1274_s24 + $0x70] sm:$0xff]  ;;  %v282_v38 = vld [vmem:[%s1279_s27 + $0x78] sm:$0xff] }
  0x20   : > { %v309_v58 = vsub.f32 %v1337_v44, %v277_v45  ;;  %v340_v59 = vmul.f32 %v307_v40, %v307_v40  ;;  %v376_v60 = vsel %vm364_vm1, %v338_v41, 0.0  ;;  %v444_v61 = vsub.f32 %v1313_v22, %v1299_v11  ;;  %v281_v27 = vld [vmem:[%s1279_s27 + $0x70] sm:$0xff] }
  0x21   : > { %v371_v46 = vadd.f32 %v370_v37, %v369_v39  ;;  %v445_v5 = vsub.f32 %v1308_v16, %v1302_v12  ;;  %v446_v6 = vsub.f32 %v1322_v31, %v1313_v22  ;;  %v310_v8 = vsub.f32 %v1357_v62, %v278_v53  ;;  %v283_v53 = vld [vmem:[%s1279_s27 + $0x80] sm:$0xff] }
  0x22   : > { %v341_v9 = vmul.f32 %v308_v49, %v308_v49  ;;  %v378_v10 = vsel %vm364_vm1, %v339_v50, 0.0  ;;  %v617_v13 = vmul.f32 %v441_v47, %v441_v47  ;;  %v447_v17 = vsub.f32 %v1325_v32, %v1308_v16  ;;  %v1397_v50 = vld [vmem:[%s1274_s24 + $0x78] sm:$0xff] }
  0x23   : > { %v373_v54 = vadd.f32 %v372_v42, %v371_v46  ;;  %v618_v18 = vmul.f32 %v442_v55, %v442_v55  ;;  %v619_v19 = vmul.f32 %v443_v56, %v443_v56  ;;  %v311_v20 = vsub.f32 %v1360_v63, %v279_v0 }
  0x24   : > { %v342_v21 = vmul.f32 %v309_v58, %v309_v58  ;;  %v380_v23 = vsel %vm364_vm1, %v340_v59, 0.0  ;;  %v448_v24 = vsub.f32 %v1334_v43, %v1322_v31  ;;  %v449_v29 = vsub.f32 %v1337_v44, %v1325_v32 }
  0x25   : > { %v375_v4 = vadd.f32 %v374_v51, %v373_v54  ;;  %v450_v30 = vsub.f32 %v1357_v62, %v1334_v43  ;;  %v620_v33 = vmul.f32 %v444_v61, %v444_v61  ;;  %v312_v34 = vsub.f32 %v1378_v25, %v280_v14  ;;  %v1400_v51 = vld [vmem:[%s1274_s24 + $0x80] sm:$0xff] }
  0x26   : > { %v343_v35 = vmul.f32 %v310_v8, %v310_v8  ;;  %v382_v36 = vsel %vm364_vm1, %v341_v9, 0.0  ;;  %v647_v37 = vsel %vm364_vm1, %v617_v13, 0.0  ;;  %v621_v40 = vmul.f32 %v445_v5, %v445_v5 }
  0x27   : > { %v377_v15 = vadd.f32 %v376_v60, %v375_v4  ;;  %v648_v41 = vsel %vm364_vm1, %v618_v18, 0.0  ;;  %v650_v42 = vsel %vm364_vm1, %v619_v19, 0.0  ;;  %v313_v45 = vsub.f32 %v1381_v26, %v281_v27  ;;  %v284_v4 = vld [vmem:[%s1279_s27 + $0x88] sm:$0xff]  ;;  %v1418_v19 = vld [vmem:[%s1274_s24 + $0x90] sm:$0xff] }
  0x28   : > { %v344_v46 = vmul.f32 %v311_v20, %v311_v20  ;;  %v384_v47 = vsel %vm364_vm1, %v342_v21, 0.0  ;;  %v649_v49 = vadd.f32 %v648_v41, %v647_v37  ;;  %v451_v55 = vsub.f32 %v1360_v63, %v1337_v44  ;;  %v1415_v18 = vld [vmem:[%s1274_s24 + $0x88] sm:$0xff]  ;;  %v285_v20 = vld [vmem:[%s1279_s27 + $0x90] sm:$0xff] }
  0x29   : > { %v379_v28 = vadd.f32 %v378_v10, %v377_v15  ;;  %v622_v56 = vmul.f32 %v446_v6, %v446_v6  ;;  %v652_v58 = vsel %vm364_vm1, %v620_v33, 0.0  ;;  %v314_v59 = vsub.f32 %v1397_v50, %v282_v38 }
  0x2a   : > { %v345_v60 = vmul.f32 %v312_v34, %v312_v34  ;;  %v386_v61 = vsel %vm364_vm1, %v343_v35, 0.0  ;;  %v651_v0 = vadd.f32 %v650_v42, %v649_v49  ;;  %v452_v8 = vsub.f32 %v1378_v25, %v1357_v62  ;;  %v287_v49 = vld [vmem:[%s1279_s27 + $0xa0] sm:$0xff] }
  0x2b   : > { %v381_v39 = vadd.f32 %v380_v23, %v379_v28  ;;  %v623_v9 = vmul.f32 %v447_v17, %v447_v17  ;;  %v654_v10 = vsel %vm364_vm1, %v621_v40, 0.0  ;;  %v315_v6 = vsub.f32 %v1400_v51, %v283_v53 }
  0x2c   : > { %v346_v13 = vmul.f32 %v313_v45, %v313_v45  ;;  %v388_v14 = vsel %vm364_vm1, %v344_v46, 0.0  ;;  %v653_v15 = vadd.f32 %v652_v58, %v651_v0  ;;  %v453_v23 = vsub.f32 %v1381_v26, %v1360_v63  ;;  %v1433_v46 = vld [vmem:[%s1274_s24 + $0x98] sm:$0xff]  ;;  %v288_v0 = vld [vmem:[%s1279_s27 + $0xa8] sm:$0xff] }
  0x2d   : > { %v383_v54 = vadd.f32 %v382_v36, %v381_v39  ;;  %v624_v17 = vmul.f32 %v448_v24, %v448_v24  ;;  %v656_v27 = vsel %vm364_vm1, %v622_v56, 0.0  ;;  %v316_v28 = vsub.f32 %v1415_v18, %v284_v4  ;;  %v286_v36 = vld [vmem:[%s1279_s27 + $0x98] sm:$0xff] }
  0x2e   : > { %v347_v33 = vmul.f32 %v314_v59, %v314_v59  ;;  %v390_v34 = vsel %vm364_vm1, %v345_v60, 0.0  ;;  %v655_v35 = vadd.f32 %v654_v10, %v653_v15  ;;  %v454_v38 = vsub.f32 %v1397_v50, %v1378_v25  ;;  %v1451_v15 = vld [vmem:[%s1274_s24 + $0xa8] sm:$0xff] }
  0x2f   : > { %v385_v5 = vadd.f32 %v384_v47, %v383_v54  ;;  %v625_v39 = vmul.f32 %v449_v29, %v449_v29  ;;  %v658_v40 = vsel %vm364_vm1, %v623_v9, 0.0  ;;  %v317_v24 = vsub.f32 %v1418_v19, %v285_v20  ;;  %v1436_v47 = vld [vmem:[%s1274_s24 + $0xa0] sm:$0xff]  ;;  %v1454_v20 = vld [vmem:[%s1274_s24 + $0xb0] sm:$0xff] }
  0x30   : > { %v348_v41 = vmul.f32 %v315_v6, %v315_v6  ;;  %v392_v42 = vsel %vm364_vm1, %v346_v13, 0.0  ;;  %v657_v45 = vadd.f32 %v656_v27, %v655_v35  ;;  %v455_v54 = vsub.f32 %v1400_v51, %v1381_v26 }
  0x31   : > { %v387_v21 = vadd.f32 %v386_v61, %v385_v5  ;;  %v626_v29 = vmul.f32 %v450_v30, %v450_v30  ;;  %v660_v56 = vsel %vm364_vm1, %v624_v17, 0.0  ;;  %v318_v58 = vsub.f32 %v1433_v46, %v286_v36 }
  0x32   : > { %v349_v59 = vmul.f32 %v316_v28, %v316_v28  ;;  %v394_v60 = vsel %vm364_vm1, %v347_v33, 0.0  ;;  %v659_v61 = vadd.f32 %v658_v40, %v657_v45  ;;  %v456_v5 = vsub.f32 %v1415_v18, %v1397_v50 }
  0x33   : > { %v389_v37 = vadd.f32 %v388_v14, %v387_v21  ;;  %v627_v9 = vmul.f32 %v451_v55, %v451_v55  ;;  %v662_v10 = vsel %vm364_vm1, %v625_v39, 0.0  ;;  %v319_v30 = vsub.f32 %v1436_v47, %v287_v49  ;;  %v289_v21 = vld [vmem:[%s1279_s27 + $0xb0] sm:$0xff] }
  0x34   : > { %v350_v6 = vmul.f32 %v317_v24, %v317_v24  ;;  %v396_v13 = vsel %vm364_vm1, %v348_v41, 0.0  ;;  %v661_v14 = vadd.f32 %v660_v56, %v659_v61  ;;  %v457_v27 = vsub.f32 %v1418_v19, %v1400_v51  ;;  %v291_v56 = vld [vmem:[%s1279_s27 + $0xc0] sm:$0xff] }
  0x35   : > { %v391_v53 = vadd.f32 %v390_v34, %v389_v37  ;;  %v628_v55 = vmul.f32 %v452_v8, %v452_v8  ;;  %v664_v28 = vsel %vm364_vm1, %v626_v29, 0.0  ;;  %v320_v33 = vsub.f32 %v1451_v15, %v288_v0  ;;  %v290_v37 = vld [vmem:[%s1279_s27 + $0xb8] sm:$0xff]  ;;  %v1472_v29 = vld [vmem:[%s1274_s24 + $0xc0] sm:$0xff] }
  0x36   : > { %v351_v34 = vmul.f32 %v318_v58, %v318_v58  ;;  %v398_v35 = vsel %vm364_vm1, %v349_v59, 0.0  ;;  %v663_v36 = vadd.f32 %v662_v10, %v661_v14  ;;  %v458_v40 = vsub.f32 %v1433_v46, %v1415_v18  ;;  %v292_v10 = vld [vmem:[%s1279_s27 + $0xc8] sm:$0xff] }
  0x37   : > { %v393_v4 = vadd.f32 %v392_v42, %v391_v53  ;;  %v629_v24 = vmul.f32 %v453_v23, %v453_v23  ;;  %v666_v41 = vsel %vm364_vm1, %v627_v9, 0.0  ;;  %v321_v8 = vsub.f32 %v1454_v20, %v289_v21  ;;  %v1469_v53 = vld [vmem:[%s1274_s24 + $0xb8] sm:$0xff] }
  0x38   : > { %v352_v42 = vmul.f32 %v319_v30, %v319_v30  ;;  %v400_v45 = vsel %vm364_vm1, %v350_v6, 0.0  ;;  %v665_v49 = vadd.f32 %v664_v28, %v663_v36  ;;  %v459_v59 = vsub.f32 %v1436_v47, %v1418_v19  ;;  %v1487_v28 = vld [vmem:[%s1274_s24 + $0xc8] sm:$0xff] }
  0x39   : > { %v395_v17 = vadd.f32 %v394_v60, %v393_v4  ;;  %v630_v23 = vmul.f32 %v454_v38, %v454_v38  ;;  %v668_v60 = vsel %vm364_vm1, %v628_v55, 0.0  ;;  %v322_v61 = vsub.f32 %v1469_v53, %v290_v37 }
  0x3a   : > { %v353_v0 = vmul.f32 %v320_v33, %v320_v33  ;;  %v402_v4 = vsel %vm364_vm1, %v351_v34, 0.0  ;;  %v667_v9 = vadd.f32 %v666_v41, %v665_v49  ;;  %v460_v6 = vsub.f32 %v1451_v15, %v1433_v46  ;;  %v1490_v33 = vld [vmem:[%s1274_s24 + $0xd0] sm:$0xff] }
  0x3b   : > { %v397_v39 = vadd.f32 %v396_v13, %v395_v17  ;;  %v631_v13 = vmul.f32 %v455_v54, %v455_v54  ;;  %v670_v14 = vsel %vm364_vm1, %v629_v24, 0.0  ;;  %v323_v38 = vsub.f32 %v1472_v29, %v291_v56  ;;  %v293_v34 = vld [vmem:[%s1279_s27 + $0xd0] sm:$0xff] }
  0x3c   : > { %v354_v21 = vmul.f32 %v321_v8, %v321_v8  ;;  %v404_v17 = vsel %vm364_vm1, %v352_v42, 0.0  ;;  %v669_v55 = vadd.f32 %v668_v60, %v667_v9  ;;  %v461_v36 = vsub.f32 %v1454_v20, %v1436_v47  ;;  %v294_v42 = vld [vmem:[%s1279_s27 + $0xd8] sm:$0xff]  ;;  %v295_v9 = vld [vmem:[%s1279_s27 + $0xe0] sm:$0xff] }
  0x3d   : > { %v399_v58 = vadd.f32 %v398_v35, %v397_v39  ;;  %v632_v54 = vmul.f32 %v456_v5, %v456_v5  ;;  %v672_v37 = vsel %vm364_vm1, %v630_v23, 0.0  ;;  %v324_v39 = vsub.f32 %v1487_v28, %v292_v10 }
  0x3e   : > { %v355_v24 = vmul.f32 %v322_v61, %v322_v61  ;;  %v406_v41 = vsel %vm364_vm1, %v353_v0, 0.0  ;;  %v671_v8 = vadd.f32 %v670_v14, %v669_v55  ;;  %v462_v49 = vsub.f32 %v1469_v53, %v1451_v15  ;;  %v1508_v0 = vld [vmem:[%s1274_s24 + $0xe0] sm:$0xff]  ;;  %v296_v14 = vld [vmem:[%s1279_s27 + $0xe8] sm:$0xff] }
  0x3f   : > { %v401_v30 = vadd.f32 %v400_v45, %v399_v58  ;;  %v633_v56 = vmul.f32 %v457_v27, %v457_v27  ;;  %v674_v58 = vsel %vm364_vm1, %v631_v13, 0.0  ;;  %v325_v5 = vsub.f32 %v1490_v33, %v293_v34  ;;  %v1518_v34 = vld [vmem:[%s1274_s24 + $0xf0] sm:$0xff] }
  0x40   : > { %v356_v23 = vmul.f32 %v323_v38, %v323_v38  ;;  %v408_v60 = vsel %vm364_vm1, %v354_v21, 0.0  ;;  %v673_v61 = vadd.f32 %v672_v37, %v671_v8  ;;  %v463_v27 = vsub.f32 %v1472_v29, %v1454_v20 }
  0x41   : > { %v403_v35 = vadd.f32 %v402_v4, %v401_v30  ;;  %v1505_v4 = vld [vmem:[%s1274_s24 + $0xd8] sm:$0xff]  ;;  %v634_v30 = vmul.f32 %v458_v40, %v458_v40  ;;  %v676_v13 = vsel %vm364_vm1, %v632_v54, 0.0  ;;  %v410_v21 = vsel %vm364_vm1, %v355_v24, 0.0 }
  0x42   : > { %v326_v38 = vsub.f32 %v1505_v4, %v294_v42  ;;  %v675_v55 = vadd.f32 %v674_v58, %v673_v61  ;;  %v635_v8 = vmul.f32 %v459_v59, %v459_v59  ;;  %v678_v40 = vsel %vm364_vm1, %v633_v56, 0.0  ;;  %v298_v54 = vld [vmem:[%s1279_s27 + $0xf8] sm:$0xff] }
  0x43   : > { %v405_v45 = vadd.f32 %v404_v17, %v403_v35  ;;  %v357_v17 = vmul.f32 %v324_v39, %v324_v39  ;;  %v297_v35 = vld [vmem:[%s1279_s27 + $0xf0] sm:$0xff]  ;;  %v327_v42 = vsub.f32 %v1508_v0, %v295_v9  ;;  %v358_v39 = vmul.f32 %v325_v5, %v325_v5 }
  0x44   : > { %v412_v24 = vsel %vm364_vm1, %v356_v23, 0.0  ;;  %v677_v58 = vadd.f32 %v676_v13, %v675_v55  ;;  %v636_v7 = vmul.f32 %v460_v6, %v460_v6  ;;  %v329_v59 = vsub.f32 %v1518_v34, %v297_v35 }
  0x45   : > { %v407_v10 = vadd.f32 %v406_v41, %v405_v45  ;;  %v464_v41 = vsub.f32 %v1487_v28, %v1469_v53  ;;  %v1525_v45 = vld [vmem:[%s1274_s24 + $0xe8] sm:$0xff]  ;;  %v359_v56 = vmul.f32 %v326_v38, %v326_v38  ;;  %v414_v48 = vsel %vm364_vm1, %v357_v17, 0.0 }
  0x46   : > { %v328_v61 = vsub.f32 %v1525_v45, %v296_v14  ;;  %v679_v52 = vadd.f32 %v678_v40, %v677_v58  ;;  %v637_v23 = vmul.f32 %v461_v36, %v461_v36  ;;  %v682_v13 = vsel %vm364_vm1, %v635_v8, 0.0 }
  0x47   : > { %v409_v37 = vadd.f32 %v408_v60, %v407_v10  ;;  %v680_v60 = vsel %vm364_vm1, %v634_v30, 0.0  ;;  %v1533_v10 = vld [vmem:[%s1274_s24 + $0xf8] sm:$0xff]  ;;  %v360_v14 = vmul.f32 %v327_v42, %v327_v42  ;;  %v416_v6 = vsel %vm364_vm1, %v358_v39, 0.0 }
  0x48   : > { %v330_v5 = vsub.f32 %v1533_v10, %v298_v54  ;;  %v465_v30 = vsub.f32 %v1490_v33, %v1472_v29  ;;  %v466_v38 = vsub.f32 %v1505_v4, %v1487_v28  ;;  %v638_v35 = vmul.f32 %v462_v49, %v462_v49 }
  0x49   : > { %v411_v57 = vadd.f32 %v410_v21, %v409_v37  ;;  %v681_v21 = vadd.f32 %v680_v60, %v679_v52  ;;  %v684_v17 = vsel %vm364_vm1, %v636_v7, 0.0  ;;  %v361_v37 = vmul.f32 %v328_v61, %v328_v61 }
  0x4a   : > { %v362_v40 = vmul.f32 %v329_v59, %v329_v59  ;;  %v363_v8 = vmul.f32 %v330_v5, %v330_v5  ;;  %v639_v42 = vmul.f32 %v463_v27, %v463_v27  ;;  %v686_v39 = vsel %vm364_vm1, %v637_v23, 0.0 }
  0x4b   : > { %v413_v9 = vadd.f32 %v412_v24, %v411_v57  ;;  %v418_v57 = vsel %vm364_vm1, %v359_v56, 0.0  ;;  %v683_v36 = vadd.f32 %v682_v13, %v681_v21  ;;  %v420_v24 = vsel %vm364_vm1, %v360_v14, 0.0 }
  0x4c   : > { %v640_v52 = vmul.f32 %v464_v41, %v464_v41  ;;  %v468_v7 = vsub.f32 %v1525_v45, %v1505_v4  ;;  %v469_v61 = vsub.f32 %v1518_v34, %v1508_v0  ;;  %v688_v60 = vsel %vm364_vm1, %v638_v35, 0.0 }
  0x4d   : > { %v415_v55 = vadd.f32 %v414_v48, %v413_v9  ;;  %v467_v48 = vsub.f32 %v1508_v0, %v1490_v33  ;;  %v685_v58 = vadd.f32 %v684_v17, %v683_v36  ;;  %v422_v27 = vsel %vm364_vm1, %v361_v37, 0.0 }
  0x4e   : > { %v470_v59 = vsub.f32 %v1533_v10, %v1525_v45  ;;  %v641_v56 = vmul.f32 %v465_v30, %v465_v30  ;;  %v424_v41 = vsel %vm364_vm1, %v362_v40, 0.0  ;;  %v426_v23 = vsel %vm364_vm1, %v363_v8, 0.0 }
  0x4f   : > { %v417_v54 = vadd.f32 %v416_v6, %v415_v55  ;;  %v687_v5 = vadd.f32 %v686_v39, %v685_v58  ;;  %v690_v13 = vsel %vm364_vm1, %v639_v42, 0.0  ;;  %v642_v14 = vmul.f32 %v466_v38, %v466_v38 }
  0x50   : > { %v692_v21 = vsel %vm364_vm1, %v640_v52, 0.0  ;;  %v1786_v55 = vrot.slane %v1286_v2, 7  ;;  %v1787_v35 = vrot.slane %v1283_v1, 7  ;;  %v1788_v30 = vrot.slane %v1299_v11, 7 }
  0x51   : > { %v419_v49 = vadd.f32 %v418_v57, %v417_v54  ;;  %v689_v6 = vadd.f32 %v688_v60, %v687_v5  ;;  %v1789_v57 = vrot.slane %v1289_v3, 7  ;;  %v510_v36 = vrot.slane %v1302_v12, 7 }
  0x52   : > { %v506_v17 = vsel %vm503_vm2, %v1787_v35, %v1786_v55  ;;  %v511_v38 = vrot.slane %v1313_v22, 7  ;;  %v643_v8 = vmul.f32 %v467_v48, %v467_v48  ;;  %v694_v42 = vsel %vm364_vm1, %v641_v56, 0.0 }
  0x53   : > { %v421_v9 = vadd.f32 %v420_v24, %v419_v49  ;;  %v509_v40 = vsel %vm503_vm2, %v1789_v57, %v1788_v30  ;;  %v691_v54 = vadd.f32 %v690_v13, %v689_v6  ;;  %v513_v39 = vrot.slane %v1308_v16, 7 }
  0x54   : > { %v514_v52 = vrot.slane %v1322_v31, 7  ;;  %v1790_v58 = vmov %v1787_v35  ;;  %v585_v60 = vsub.f32 %v1286_v2, %v506_v17  ;;  %v587_v13 = vsub.f32 %v1299_v11, %v509_v40 }
  0x55   : > { %v423_v37 = vadd.f32 %v422_v27, %v421_v9  ;;  %v584_v49 = vsub.f32 %v1283_v1, %v1790_v58  ;;  %v644_v27 = vmul.f32 %v468_v7, %v468_v7  ;;  %v693_v5 = vadd.f32 %v692_v21, %v691_v54 }
  0x56   : > { %v1791_v9 = vmov %v1789_v57  ;;  %v645_v6 = vmul.f32 %v469_v61, %v469_v61  ;;  %v512_v55 = vsel %vm503_vm2, %v510_v36, %v511_v38  ;;  %v698_v1 = vsel %vm364_vm1, %v643_v8, 0.0 }
  0x57   : > { %v425_v24 = vadd.f32 %v424_v41, %v423_v37  ;;  %v586_v48 = vsub.f32 %v1289_v3, %v1791_v9  ;;  %v696_v41 = vsel %vm364_vm1, %v642_v14, 0.0  ;;  %v695_v35 = vadd.f32 %v694_v42, %v693_v5 }
  0x58   : > { %v516_v2 = vrot.slane %v1325_v32, 7  ;;  %v517_v7 = vrot.slane %v1334_v43, 7  ;;  %v515_v21 = vsel %vm503_vm2, %v513_v39, %v514_v52  ;;  %v588_v3 = vsub.f32 %v1302_v12, %v510_v36 }
  0x59   : > { %v427_v56 = vadd.f32 %v426_v23, %v425_v24  ;;  %v719_v11 = vmul.f32 %v584_v49, %v584_v49  ;;  %v720_v17 = vmul.f32 %v585_v60, %v585_v60  ;;  %v697_v23 = vadd.f32 %v696_v41, %v695_v35 }
  0x5a   : > { %v589_v61 = vsub.f32 %v1313_v22, %v512_v55  ;;  %v721_v14 = vmul.f32 %v586_v48, %v586_v48  ;;  %v722_v37 = vmul.f32 %v587_v13, %v587_v13  ;;  %v646_v30 = vmul.f32 %v470_v59, %v470_v59 }
  0x5b   : > { %428 = vadd.xlane.f32.xlu0 %v427_v56  ;;  %v700_v57 = vsel %vm364_vm1, %v644_v27, 0.0  ;;  %v702_v40 = vsel %vm364_vm1, %v645_v6, 0.0  ;;  %v519_v38 = vrot.slane %v1337_v44, 7  ;;  %v699_v8 = vadd.f32 %v698_v1, %v697_v23 }
  0x5c   : > { %v518_v54 = vsel %vm503_vm2, %v516_v2, %v517_v7  ;;  %v520_v42 = vrot.slane %v1357_v62, 7  ;;  %v590_v12 = vsub.f32 %v1308_v16, %v513_v39  ;;  %v591_v36 = vsub.f32 %v1322_v31, %v515_v21 }
  0x5d   : > { %v723_v24 = vmul.f32 %v588_v3, %v588_v3  ;;  %v784_v22 = vrot.slane %v719_v11, 1  ;;  %v785_v52 = vrot.slane %v720_v17, 1  ;;  %v701_v58 = vadd.f32 %v700_v57, %v699_v8 }
  0x5e   : > { %v724_v59 = vmul.f32 %v589_v61, %v589_v61  ;;  %v787_v49 = vrot.slane %v721_v14, 1  ;;  %v788_v60 = vrot.slane %v722_v37, 1  ;;  %v704_v27 = vsel %vm364_vm1, %v646_v30, 0.0 }
  0x5f   : > { %v522_v5 = vrot.slane %v1360_v63, 7  ;;  %v523_v9 = vrot.slane %v1378_v25, 7  ;;  %v703_v48 = vadd.f32 %v702_v40, %v701_v58  ;;  %v521_v13 = vsel %vm503_vm2, %v519_v38, %v520_v42 }
  0x60   : > { %v592_v16 = vsub.f32 %v1325_v32, %v516_v2  ;;  %v593_v31 = vsub.f32 %v1334_v43, %v518_v54  ;;  %v725_v39 = vmul.f32 %v590_v12, %v590_v12  ;;  %v726_v56 = vmul.f32 %v591_v36, %v591_v36 }
  0x61   : > { %v786_v6 = vsel %vm783_vm3, %v784_v22, %v785_v52  ;;  %v705_v41 = vadd.f32 %v704_v27, %v703_v48  ;;  %v789_v55 = vsel %vm783_vm3, %v787_v49, %v788_v60  ;;  %v790_v35 = vrot.slane %v723_v24, 1 }
  0x62   : > { %v791_v1 = vrot.slane %v724_v59, 1  ;;  %v524_v7 = vsel %vm503_vm2, %v522_v5, %v523_v9  ;;  %v525_v21 = vrot.slane %v1381_v26, 7  ;;  %v526_v3 = vrot.slane %v1397_v50, 7 }
  0x63   : > { %706 = vadd.xlane.f32.xlu0 %v705_v41  ;;  %v594_v32 = vsub.f32 %v1337_v44, %v519_v38  ;;  %v595_v43 = vsub.f32 %v1357_v62, %v521_v13  ;;  %v864_v2 = vsel %vm364_vm1, %v786_v6, 0.0  ;;  %v727_v11 = vmul.f32 %v592_v16, %v592_v16 }
  0x64   : > { %v728_v17 = vmul.f32 %v593_v31, %v593_v31  ;;  %v866_v23 = vsel %vm865_vm4, %v785_v52, 0.0  ;;  %v868_v61 = vsel %vm364_vm1, %v789_v55, 0.0  ;;  %v792_v14 = vsel %vm783_vm3, %v790_v35, %v791_v1 }
  0x65   : > { %v793_v37 = vrot.slane %v725_v39, 1  ;;  %v794_v30 = vrot.slane %v726_v56, 1  ;;  %v867_v57 = vadd.f32 %v866_v23, %v864_v2  ;;  %v528_v40 = vrot.slane %v1400_v51, 7 }
  0x66   : > { %v870_v44 = vsel %vm865_vm4, %v788_v60, 0.0  ;;  %v527_v62 = vsel %vm503_vm2, %v525_v21, %v526_v3  ;;  %v529_v38 = vrot.slane %v1415_v18, 7  ;;  %v596_v8 = vsub.f32 %v1360_v63, %v522_v5 }
  0x67   : > { %v869_v54 = vadd.f32 %v868_v61, %v867_v57  ;;  %v597_v42 = vsub.f32 %v1378_v25, %v524_v7  ;;  %v729_v12 = vmul.f32 %v594_v32, %v594_v32  ;;  %v730_v36 = vmul.f32 %v595_v43, %v595_v43 }
  0x68   : > { %v872_v24 = vsel %vm364_vm1, %v792_v14, 0.0  ;;  %v795_v22 = vsel %vm783_vm3, %v793_v37, %v794_v30  ;;  %v796_v52 = vrot.slane %v727_v11, 1  ;;  %v797_v58 = vrot.slane %v728_v17, 1 }
  0x69   : > { %v871_v59 = vadd.f32 %v870_v44, %v869_v54  ;;  %v531_v49 = vrot.slane %v1418_v19, 7  ;;  %v874_v60 = vsel %vm865_vm4, %v791_v1, 0.0  ;;  %v530_v27 = vsel %vm503_vm2, %v528_v40, %v529_v38 }
  0x6a   : > { %v532_v63 = vrot.slane %v1433_v46, 7  ;;  %v598_v5 = vsub.f32 %v1381_v26, %v525_v21  ;;  %v599_v9 = vsub.f32 %v1397_v50, %v527_v62  ;;  %v731_v48 = vmul.f32 %v596_v8, %v596_v8 }
  0x6b   : > { %v873_v25 = vadd.f32 %v872_v24, %v871_v59  ;;  %v732_v13 = vmul.f32 %v597_v42, %v597_v42  ;;  %v876_v16 = vsel %vm364_vm1, %v795_v22, 0.0  ;;  %v798_v31 = vsel %vm783_vm3, %v796_v52, %v797_v58 }
  0x6c   : > { %v799_v39 = vrot.slane %v729_v12, 1  ;;  %v800_v56 = vrot.slane %v730_v36, 1  ;;  %v534_v41 = vrot.slane %v1436_v47, 7  ;;  %v878_v55 = vsel %vm865_vm4, %v794_v30, 0.0 }
  0x6d   : > { %v875_v6 = vadd.f32 %v874_v60, %v873_v25  ;;  %v533_v35 = vsel %vm503_vm2, %v531_v49, %v532_v63  ;;  %v535_v26 = vrot.slane %v1451_v15, 7  ;;  %v600_v1 = vsub.f32 %v1400_v51, %v528_v40 }
  0x6e   : > { %v601_v7 = vsub.f32 %v1415_v18, %v530_v27  ;;  %v733_v21 = vmul.f32 %v598_v5, %v598_v5  ;;  %v734_v3 = vmul.f32 %v599_v9, %v599_v9  ;;  %v880_v32 = vsel %vm364_vm1, %v798_v31, 0.0 }
  0x6f   : > { %v877_v50 = vadd.f32 %v876_v16, %v875_v6  ;;  %v801_v43 = vsel %vm783_vm3, %v799_v39, %v800_v56  ;;  %v802_v2 = vrot.slane %v731_v48, 1  ;;  %v803_v11 = vrot.slane %v732_v13, 1 }
  0x70   : > { %v537_v23 = vrot.slane %v1454_v20, 7  ;;  %v882_v61 = vsel %vm865_vm4, %v797_v58, 0.0  ;;  %v536_v14 = vsel %vm503_vm2, %v534_v41, %v535_v26  ;;  %v538_v51 = vrot.slane %v1469_v53, 7 }
  0x71   : > { %v879_v17 = vadd.f32 %v878_v55, %v877_v50  ;;  %v602_v37 = vsub.f32 %v1418_v19, %v531_v49  ;;  %v603_v30 = vsub.f32 %v1433_v46, %v533_v35  ;;  %v735_v57 = vmul.f32 %v600_v1, %v600_v1 }
  0x72   : > { %v736_v40 = vmul.f32 %v601_v7, %v601_v7  ;;  %v884_v44 = vsel %vm364_vm1, %v801_v43, 0.0  ;;  %v804_v62 = vsel %vm783_vm3, %v802_v2, %v803_v11  ;;  %v805_v38 = vrot.slane %v733_v21, 1 }
  0x73   : > { %v881_v18 = vadd.f32 %v880_v32, %v879_v17  ;;  %v806_v8 = vrot.slane %v734_v3, 1  ;;  %v540_v42 = vrot.slane %v1472_v29, 7  ;;  %v886_v12 = vsel %vm865_vm4, %v800_v56, 0.0 }
  0x74   : > { %v539_v36 = vsel %vm503_vm2, %v537_v23, %v538_v51  ;;  %v541_v19 = vrot.slane %v1487_v28, 7  ;;  %v604_v24 = vsub.f32 %v1436_v47, %v534_v41  ;;  %v605_v22 = vsub.f32 %v1451_v15, %v536_v14 }
  0x75   : > { %v883_v54 = vadd.f32 %v882_v61, %v881_v18  ;;  %v737_v52 = vmul.f32 %v602_v37, %v602_v37  ;;  %v738_v58 = vmul.f32 %v603_v30, %v603_v30  ;;  %v888_v59 = vsel %vm364_vm1, %v804_v62, 0.0 }
  0x76   : > { %v807_v49 = vsel %vm783_vm3, %v805_v38, %v806_v8  ;;  %v808_v60 = vrot.slane %v735_v57, 1  ;;  %v809_v27 = vrot.slane %v736_v40, 1  ;;  %v543_v5 = vrot.slane %v1490_v33, 7 }
  0x77   : > { %v885_v46 = vadd.f32 %v884_v44, %v883_v54  ;;  %v890_v25 = vsel %vm865_vm4, %v803_v11, 0.0  ;;  %v542_v9 = vsel %vm503_vm2, %v540_v42, %v541_v19  ;;  %v544_v47 = vrot.slane %v1505_v4, 7 }
  0x78   : > { %v606_v48 = vsub.f32 %v1454_v20, %v537_v23  ;;  %v607_v13 = vsub.f32 %v1469_v53, %v539_v36  ;;  %v739_v16 = vmul.f32 %v604_v24, %v604_v24  ;;  %v740_v31 = vmul.f32 %v605_v22, %v605_v22 }
  0x79   : > { %v887_v63 = vadd.f32 %v886_v12, %v885_v46  ;;  %v892_v39 = vsel %vm364_vm1, %v807_v49, 0.0  ;;  %v810_v56 = vsel %vm783_vm3, %v808_v60, %v809_v27  ;;  %v811_v6 = vrot.slane %v737_v52, 1 }
  0x7a   : > { %v812_v41 = vrot.slane %v738_v58, 1  ;;  %v546_v35 = vrot.slane %v1508_v0, 7  ;;  %v894_v26 = vsel %vm865_vm4, %v806_v8, 0.0  ;;  %v545_v1 = vsel %vm503_vm2, %v543_v5, %v544_v47 }
  0x7b   : > { %v889_v15 = vadd.f32 %v888_v59, %v887_v63  ;;  %v547_v20 = vrot.slane %v1525_v45, 7  ;;  %v608_v50 = vsub.f32 %v1472_v29, %v540_v42  ;;  %v609_v7 = vsub.f32 %v1487_v28, %v542_v9 }
  0x7c   : > { %v741_v21 = vmul.f32 %v606_v48, %v606_v48  ;;  %v742_v3 = vmul.f32 %v607_v13, %v607_v13  ;;  %v896_v32 = vsel %vm364_vm1, %v810_v56, 0.0  ;;  %v813_v43 = vsel %vm783_vm3, %v811_v6, %v812_v41 }
  0x7d   : > { %v891_v55 = vadd.f32 %v890_v25, %v889_v15  ;;  %v814_v2 = vrot.slane %v739_v16, 1  ;;  %v815_v11 = vrot.slane %v740_v31, 1  ;;  %v549_v23 = vrot.slane %v1518_v34, 7 }
  0x7e   : > { %v898_v61 = vsel %vm865_vm4, %v809_v27, 0.0  ;;  %v548_v14 = vsel %vm503_vm2, %v546_v35, %v547_v20  ;;  %v550_v29 = vrot.slane %v1533_v10, 7  ;;  %v610_v51 = vsub.f32 %v1490_v33, %v543_v5 }
  0x7f   : > { %v893_v53 = vadd.f32 %v892_v39, %v891_v55  ;;  %v611_v37 = vsub.f32 %v1505_v4, %v545_v1  ;;  %v743_v18 = vmul.f32 %v608_v50, %v608_v50  ;;  %v744_v30 = vmul.f32 %v609_v7, %v609_v7 }
  0x80   : > { %v900_v57 = vsel %vm364_vm1, %v813_v43, 0.0  ;;  %v816_v40 = vsel %vm783_vm3, %v814_v2, %v815_v11  ;;  %v817_v44 = vrot.slane %v741_v21, 1  ;;  %v818_v62 = vrot.slane %v742_v3, 1 }
  0x81   : > { %v895_v17 = vadd.f32 %v894_v26, %v893_v53  ;;  %v902_v8 = vsel %vm865_vm4, %v812_v41, 0.0  ;;  %v551_v54 = vsel %vm503_vm2, %v549_v23, %v550_v29  ;;  %v612_v42 = vsub.f32 %v1508_v0, %v546_v35 }
  0x82   : > { %v613_v33 = vsub.f32 %v1525_v45, %v548_v14  ;;  %v745_v36 = vmul.f32 %v610_v51, %v610_v51  ;;  %v746_v4 = vmul.f32 %v611_v37, %v611_v37  ;;  %v904_v19 = vsel %vm364_vm1, %v816_v40, 0.0 }
  0x83   : > { %v897_v28 = vadd.f32 %v896_v32, %v895_v17  ;;  %v819_v24 = vsel %vm783_vm3, %v817_v44, %v818_v62  ;;  %v820_v46 = vrot.slane %v743_v18, 1  ;;  %v821_v22 = vrot.slane %v744_v30, 1 }
  0x84   : > { %v906_v58 = vsel %vm865_vm4, %v815_v11, 0.0  ;;  %v614_v59 = vsub.f32 %v1518_v34, %v549_v23  ;;  %v615_v60 = vsub.f32 %v1533_v10, %v551_v54  ;;  %v747_v0 = vmul.f32 %v612_v42, %v612_v42  ;;  %v331_v54 = vld [vmem:[#allocation2] sm:$0x1] }
  0x85   : > { %v899_v38 = vadd.f32 %v898_v61, %v897_v28  ;;  %v748_v27 = vmul.f32 %v613_v33, %v613_v33  ;;  %v908_v45 = vsel %vm364_vm1, %v819_v24, 0.0  ;;  %v822_v63 = vsel %vm783_vm3, %v820_v46, %v821_v22  ;;  %v616_v33 = vld [vmem:[#allocation3] sm:$0x1] }
  0x86   : > { %v823_v5 = vrot.slane %v745_v36, 1  ;;  %v824_v25 = vrot.slane %v746_v4, 1  ;;  %v910_v47 = vsel %vm865_vm4, %v818_v62, 0.0  ;;  %v749_v15 = vmul.f32 %v614_v59, %v614_v59 }
  0x87   : > { %v901_v12 = vadd.f32 %v900_v57, %v899_v38  ;;  %v750_v13 = vmul.f32 %v615_v60, %v615_v60  ;;  %v912_v16 = vsel %vm364_vm1, %v822_v63, 0.0  ;;  %v826_v31 = vrot.slane %v747_v0, 1 }
  0x88   : > { %v825_v34 = vsel %vm783_vm3, %v823_v5, %v824_v25  ;;  %v827_v10 = vrot.slane %v748_v27, 1  ;;  %v914_v56 = vsel %vm865_vm4, %v821_v22, 0.0  ;;  %v829_v35 = vrot.slane %v749_v15, 1 }
  0x89   : > { %v903_v52 = vadd.f32 %v902_v8, %v901_v12  ;;  %v916_v41 = vsel %vm364_vm1, %v825_v34, 0.0  ;;  %v830_v26 = vrot.slane %v750_v13, 1  ;;  %v918_v20 = vsel %vm865_vm4, %v824_v25, 0.0 }
  0x8a   : > { %v828_v55 = vsel %vm783_vm3, %v826_v31, %v827_v10  ;;  %v922_v3 = vsel %vm865_vm4, %v827_v10, 0.0 }
  0x8b   : > { %v905_v49 = vadd.f32 %v904_v19, %v903_v52  ;;  %v920_v53 = vsel %vm364_vm1, %v828_v55, 0.0  ;;  %v831_v7 = vsel %vm783_vm3, %v829_v35, %v830_v26  ;;  %v926_v11 = vsel %vm865_vm4, %v830_v26, 0.0 }
  0x8c   : > { %v924_v43 = vsel %vm364_vm1, %v831_v7, 0.0 }
  0x8d   : > { %v907_v9 = vadd.f32 %v906_v58, %v905_v49  ;;  %v718_v49 = vld [vmem:[#allocation4] sm:$0x1] }
  0x8f   : > { %v909_v48 = vadd.f32 %v908_v45, %v907_v9 }
  0x91   : > { %v911_v39 = vadd.f32 %v910_v47, %v909_v48  ;;  %v953_v47 = vld [vmem:[%s1782_s2] sm:$0x1] (!%p1082_p5) }
  0x92   : > { %v954_v15 = vsub.f32 (!%p1082_p5), 1.0, %v953_v47 }
  0x93   : > { %v913_v6 = vadd.f32 %v912_v16, %v911_v39 }
  0x94   : > { %v956_v13 = vsel (!%p1082_p5), %vm955_vm6, %v954_v15, 0.0 }
  0x95   : > { %v915_v1 = vadd.f32 %v914_v56, %v913_v6  ;;  %957 = vadd.xlane.f32.xlu0 (!%p1082_p5), %v956_v13 }
  0x97   : > { %v917_v50 = vadd.f32 %v916_v41, %v915_v1 }
  0x99   : > { %v919_v21 = vadd.f32 %v918_v20, %v917_v50 }
  0x9b   : > { %v921_v32 = vadd.f32 %v920_v53, %v919_v21 }
  0x9d   : > { %v923_v2 = vadd.f32 %v922_v3, %v921_v32 }
  0x9f   : > { %v925_v17 = vadd.f32 %v924_v43, %v923_v2 }
  0xa1   : > { %v927_v23 = vadd.f32 %v926_v11, %v925_v17 }
  0xa3   : > { %928 = vadd.xlane.f32.xlu1 %v927_v23 }
  0xe8   : > { %v429_v61 = vpop.xlane.xlu0 %428 }
  0xe9   : > { %v430_v14 = vrot.slane %v429_v61, 4 }
  0xeb   : > { %v431_v29 = vadd.f32 %v430_v14, %v429_v61 }
  0xed   : > { %v432_v51 = vrot.slane %v431_v29, 2 }
  0xef   : > { %v433_v28 = vadd.f32 %v432_v51, %v431_v29 }
  0xf0   : > { %v707_v18 = vpop.xlane.xlu0 %706 }
  0xf1   : > { %v434_v37 = vrot.slane %v433_v28, 1  ;;  %v708_v57 = vrot.slane %v707_v18, 4 }
  0xf3   : > { %v435_v30 = vadd.f32 %v434_v37, %v433_v28  ;;  %v709_v40 = vadd.f32 %v708_v57, %v707_v18 }
  0xf5   : > { %1093 = vpush %v435_v30  ;;  %v710_v44 = vrot.slane %v709_v40, 2 }
  0xf7   : > { %v711_v62 = vadd.f32 %v710_v44, %v709_v40 }
  0xf9   : > { %v712_v38 = vrot.slane %v711_v62, 1 }
  0xfb   : > { %v713_v8 = vadd.f32 %v712_v38, %v711_v62 }
  0xfd   : > { %1095 = vpush %v713_v8 }
 0x122   : > { %v958_v16 = vpop.xlane.xlu0 (!%p1082_p5), %957 }
 0x123   : > { %v959_v34 = vrot.slane (!%p1082_p5), %v958_v16, 4 }
 0x125   : > { %v960_v31 = vadd.f32 (!%p1082_p5), %v959_v34, %v958_v16 }
 0x126   : > { %s1094_s28 = spop %1093 }
 0x127   : > { %v437_v42 = vstv %s1094_s28  ;;  %v961_v10 = vrot.slane (!%p1082_p5), %v960_v31, 2 }
 0x128   : > { %v438_v12 = vadd.f32 %v437_v42, %v331_v54 }
 0x129   : > { %v962_v39 = vadd.f32 (!%p1082_p5), %v961_v10, %v960_v31 }
 0x12a   : > { %440 = vst.msk [vmem:[#allocation2] sm:$0x1] %vm439_vm5, %v438_v12 }
 0x12b   : > { %v963_v56 = vrot.slane (!%p1082_p5), %v962_v39, 1 }
 0x12d   : > { %v964_v6 = vadd.f32 (!%p1082_p5), %v963_v56, %v962_v39 }
 0x12e   : > { %s1096_s29 = spop %1095 }
 0x12f   : > { %v715_v36 = vstv %s1096_s29 }
 0x130   : > { %v929_v4 = vpop.xlane.xlu1 %928  ;;  %v716_v19 = vadd.f32 %v715_v36, %v616_v33 }
 0x131   : > { %v930_v24 = vrot.slane %v929_v4, 4  ;;  %v944_v27 = vld [vmem:[#allocation2] sm:$0x1] (!%p1082_p5) }
 0x132   : > { %717 = vst.msk [vmem:[#allocation3] sm:$0x1] %vm439_vm5, %v716_v19  ;;  %v945_v5 = vmul.f32 (!%p1082_p5), 0.0006510417, %v944_v27 }
 0x133   : > { %v931_v46 = vadd.f32 %v930_v24, %v929_v4 }
 0x134   : > { %946 = vst.msk [vmem:[#allocation5] sm:$0x1] (!%p1082_p5), %vm439_vm5, %v945_v5 }
 0x135   : > { %v932_v22 = vrot.slane %v931_v46, 2 }
 0x137   : > { %v933_v52 = vadd.f32 %v932_v22, %v931_v46 }
 0x139   : > { %v934_v58 = vrot.slane %v933_v52, 1  ;;  %v947_v45 = vld [vmem:[#allocation3] sm:$0x1] (!%p1082_p5) }
 0x13a   : > { %v948_v25 = vmul.f32 (!%p1082_p5), 0.0013888889, %v947_v45 }
 0x13b   : > { %v935_v59 = vadd.f32 %v934_v58, %v933_v52 }
 0x13d   : > { %1097 = vpush %v935_v59 }
 0x13e   : > { %1099 = vpush (!%p1082_p5), %v964_v6 }
 0x16c   : > { %943 = sbr.rel (%p1082_p5) target bundleno = 383 (0x17f), region = 40 }
 0x16e   : > { %s1098_s30 = spop %1097 }
 0x16f   : > { %v937_v60 = vstv %s1098_s30  ;;  %s1100_s8 = spop (!%p1082_p5), %1099 }
 0x170   : > { %v938_v0 = vadd.f32 %v937_v60, %v718_v49  ;;  %s968_s9 = smul.f32 (!%p1082_p5), 0.5, %s1100_s8 }
 0x172   : > { %939 = vst.msk [vmem:[#allocation4] sm:$0x1] %vm439_vm5, %v938_v0  ;;  %v969_v41 = vstv (!%p1082_p5), %s968_s9 }
 0x173   : > { %971 = vst.msk [vmem:[#allocation9] sm:$0x1] %vm439_vm5, %v969_v41 }
 0x179   : > { %v949_v63 = vld [vmem:[#allocation4] sm:$0x1] }
 0x17a   : > { %v950_v9 = vmul.f32 0.0013888889, %v949_v63 }
 0x17c   : > { %v951_v48 = vadd.f32 %v950_v9, %v948_v25 }
 0x17e   : > { %952 = vst.msk [vmem:[#allocation7] sm:$0x1] %vm439_vm5, %v951_v48 }
 0x17f PF: > { %p1113_p6 = scmp.eq.s32.totalorder %s1265_s19, 1  ;;  %s1226_s10 = smov [#allocation7]  }
 0x180   : > { %s990_s11 = sshll.u32 %s1226_s10, 4  ;;  %s1227_s12 = smov [#allocation5]   ;;  %s991_s11 = int_to_ptr.vmem [resolvable:$true] %s990_s11 }
 0x181   : > { %s979_s13 = sshll.u32 %s1227_s12, 4  ;;  %s1131_s14 = scalar_lea.vmem %s991_s11, 16  ;;  %s980_s13 = int_to_ptr.vmem [resolvable:$true] %s979_s13 }
 0x182   : > { %p1132_p7 = scmp.ne.s32.totalorder %s991_s11, %s1131_s14  ;;  %s1137_s15 = scalar_lea.vmem %s991_s11, 32 }
 0x183   : > { %p1138_p10 = scmp.lt.s32.totalorder %s991_s11, %s991_s11  ;;  %p1139_p11 = scmp.lt.s32.totalorder %s1137_s15, %s1131_s14 }
 0x184   : > { %p1133_p8 = pnand %p1132_p7, %p1113_p6 }
 0x185   : > { %p1140_p12 = por %p1139_p11, %p1138_p10 }
 0x186   : > { %p1134_p9 = pneg %p1133_p8 }
 0x188   : > { %p1141_p13 = pnand %p1140_p12, %p1134_p9 }
 0x18a   : > { %1144 = shalt.err (!%p1141_p13)
}
 0x18b   : > { %s1145_s20 = scalar_lea.hbm %s1784_s4, 16 }
 0x18c   : > { %p1146_p0 = scmp.ne.s32.totalorder %s1784_s4, %s1145_s20  ;;  %p1151_p3 = scmp.lt.u32.totalorder %s1145_s20, %s1784_s4 }
 0x18e   : > { %p1147_p1 = pnand %p1146_p0, %p1113_p6 }
 0x190   : > { %p1148_p2 = pneg %p1147_p1 }
 0x192   : > { %p1153_p4 = pnand %p1151_p3, %p1148_p2 }
 0x194   : > { %1156 = shalt.err (!%p1153_p4)
}
 0x195   : > { %1104 = dma.vmem_to_hbm [thread:$0]  (%p1113_p6), %s991_s11, 16, %s1784_s4, [#allocation8]  }
 0x196   : > { %s1157_s27 = scalar_lea.vmem %s980_s13, 16  ;;  %s1163_s28 = scalar_lea.vmem %s980_s13, 32 }
 0x197   : > { %p1158_p5 = scmp.ne.s32.totalorder %s980_s13, %s1157_s27  ;;  %p1164_p9 = scmp.lt.s32.totalorder %s980_s13, %s980_s13 }
 0x198   : > { %p1165_p10 = scmp.lt.s32.totalorder %s1163_s28, %s1157_s27 }
 0x199   : > { %p1159_p7 = pnand %p1158_p5, %p1113_p6 }
 0x19a   : > { %p1166_p11 = por %p1165_p10, %p1164_p9 }
 0x19b   : > { %p1160_p8 = pneg %p1159_p7 }
 0x19d   : > { %p1167_p12 = pnand %p1166_p11, %p1160_p8 }
 0x19f   : > { %1170 = shalt.err (!%p1167_p12)
}
 0x1a0   : > { %s1171_s6 = scalar_lea.hbm %s1783_s3, 16 }
 0x1a1   : > { %p1172_p13 = scmp.ne.s32.totalorder %s1783_s3, %s1171_s6  ;;  %p1177_p2 = scmp.lt.u32.totalorder %s1171_s6, %s1783_s3 }
 0x1a3   : > { %p1173_p0 = pnand %p1172_p13, %p1113_p6 }
 0x1a5   : > { %p1174_p1 = pneg %p1173_p0 }
 0x1a7   : > { %p1179_p3 = pnand %p1177_p2, %p1174_p1 }
 0x1a9   : > { %1182 = shalt.err (!%p1179_p3)
}
 0x1aa   : > { %1102 = dma.vmem_to_hbm [thread:$0]  (%p1113_p6), %s980_s13, 16, %s1783_s3, [#allocation6]  }
 0x1ab   : > { %s1228_s14 = smov [#allocation9]  }
 0x1ac   : > { %s1001_s15 = sshll.u32 %s1228_s14, 4  ;;  %s1002_s15 = int_to_ptr.vmem [resolvable:$true] %s1001_s15 }
 0x1ad   : > { %s1183_s16 = scalar_lea.vmem %s1002_s15, 16  ;;  %s1189_s17 = scalar_lea.vmem %s1002_s15, 32 }
 0x1ae   : > { %p1184_p4 = scmp.ne.s32.totalorder %s1002_s15, %s1183_s16  ;;  %p1190_p8 = scmp.lt.s32.totalorder %s1002_s15, %s1002_s15 }
 0x1af   : > { %p1191_p9 = scmp.lt.s32.totalorder %s1189_s17, %s1183_s16 }
 0x1b0   : > { %p1185_p5 = pnand %p1184_p4, %p1113_p6 }
 0x1b1   : > { %p1192_p10 = por %p1191_p9, %p1190_p8 }
 0x1b2   : > { %p1186_p7 = pneg %p1185_p5 }
 0x1b4   : > { %p1193_p11 = pnand %p1192_p10, %p1186_p7 }
 0x1b6   : > { %1196 = shalt.err (!%p1193_p11)
}
 0x1b7   : > { %s1197_s22 = scalar_lea.hbm %s1785_s5, 16 }
 0x1b8   : > { %p1198_p12 = scmp.ne.s32.totalorder %s1785_s5, %s1197_s22  ;;  %p1203_p1 = scmp.lt.u32.totalorder %s1197_s22, %s1785_s5 }
 0x1ba   : > { %p1199_p13 = pnand %p1198_p12, %p1113_p6 }
 0x1bc   : > { %p1200_p0 = pneg %p1199_p13 }
 0x1be   : > { %p1205_p2 = pnand %p1203_p1, %p1200_p0 }
 0x1c0   : > { %1208 = shalt.err (!%p1205_p2)
}
 0x1c1   : > { %1106 = dma.vmem_to_hbm [thread:$0]  (%p1113_p6), %s1002_s15, 16, %s1785_s5, [#allocation8]  }
 0x1c2   : > { %1214 = dma.done.wait (%p1113_p6), [#allocation6], 16  }
 0x1c3   : > { %1216 = vsyncadd (%p1113_p6), [#allocation6], 4294967280 }
 0x1c4   : > { %1218 = dma.done.wait (%p1113_p6), [#allocation8], 32  }
 0x1c5   : > { %1220 = vsyncadd (%p1113_p6), [#allocation8], 4294967264 }
 0x1c6 PF: > { %s18_s18 = sadd.s32 1, %s1223_s18  }
 0x1c7   : > { %p15_p3 = scmp.ge.s32.totalorder %s18_s18, 4  }
 0x1c9   :  { %17 = sbr.rel (!%p15_p3) target bundleno = 2 (0x2), region = 86 }
 0x1d0   :  { %1022 = vsyncpa [#allocation6], 1 }
 0x1d1   :  { %1024 = vsyncpa [#allocation6 + $0x1], 1 }
 0x1d2   :  { %1025 = vsyncpa [#allocation8], 1 }

</bundles_post_ra>
